<compile_context>
chip_gen: v7x
topology: tpu7x:2x2x1
jax: 0.10.0
libtpu: 0.0.40
codegen_flags: <defaults>
</compile_context>

<pallas_src>
import functools

import jax
import jax.numpy as jnp
from jax.experimental import pallas as pl
from jax.experimental.pallas import tpu as pltpu


def _ce_partial_kernel(logits_ref, labels_ref, out_ref, *,
                       ignore_index: int, label_smoothing: float,
                       vocab_size: int):
    """One (tile_s, V) logits tile -> lane-dense (loss_sum, valid_count) block."""
    x = logits_ref[0]          # (tile_s, V), native dtype (bf16 stays bf16)
    lbl = labels_ref[0]        # (tile_s, 1) int32, pre-shifted / padded

    # Numerically-stable per-row softmax pieces.  Elementwise math stays in the
    # native dtype; reductions / accumulations are f32.
    m = jnp.max(x, axis=-1, keepdims=True)                       # exact in bf16
    e = jnp.exp(x - m)                                           # EUP
    sum_e = jnp.sum(e.astype(jnp.float32), axis=-1, keepdims=True)
    lse = m.astype(jnp.float32) + jnp.log(sum_e)                 # (tile_s, 1) f32

    # Target-logit gather: iota/compare/select (no dynamic lane gather on TPU).
    # Rows with label == ignore_index (incl. edge padding) hit no class -> 0.
    iota = jax.lax.broadcasted_iota(jnp.int32, x.shape, 1)
    hit = iota == lbl
    tgt = jnp.sum(jnp.where(hit, x, 0.0), axis=-1,
                  keepdims=True).astype(jnp.float32)
    nll = lse - tgt

    if label_smoothing > 0.0:   # statically skipped when eps == 0
        sum_x = jnp.sum(x.astype(jnp.float32), axis=-1, keepdims=True)
        smooth = lse - sum_x * (1.0 / float(vocab_size))
        per_tok = (1.0 - label_smoothing) * nll + label_smoothing * smooth
    else:
        per_tok = nll

    # OOB rows of the last seq tile may carry garbage (possibly NaN/Inf), but
    # every reduction above is per-row, so the damage is confined to the row
    # itself; this O(tile_s) select drops it (select ignores NaN in the
    # unselected operand).  No O(tile_s*V) masking on any tile.
    valid = lbl != ignore_index
    per_tok = jnp.where(valid, per_tok, 0.0)

    tile_sum = jnp.sum(per_tok)
    tile_cnt = jnp.sum(valid.astype(jnp.float32))

    out_ref[...] = jnp.concatenate(
        [jnp.broadcast_to(tile_sum, (1, 1, 1, 128)),
         jnp.broadcast_to(tile_cnt, (1, 1, 1, 128))], axis=2)


def _vmem_budgets():
    """(tile budget bytes, vmem_limit_bytes), generation-aware."""
    cap = None
    try:
        cap = pltpu.get_tpu_info().vmem_capacity_bytes
    except Exception:
        cap = None
    if cap is None:
        cap = 64 * 1024 * 1024                      # assume smallest (v7x-like)
    if cap <= 80 * 1024 * 1024:                     # v7x: 64 MiB per TensorCore
        return 20 * 1024 * 1024, 40 * 1024 * 1024
    return 32 * 1024 * 1024, 48 * 1024 * 1024       # v5e / v6e: 128 MiB


def _pick_tile_s(S, V, itemsize, max_tile, vmem_budget):
    """Largest seq tile keeping double-buffered inputs + f32-wide temps in budget."""
    # 2x double-buffered logits block + ~4 f32-wide (tile_s, V) temps
    # (upcast/exp/iota/select results) + double-buffered label block per row.
    per_row = V * (2 * itemsize + 4 * 4) + 2 * 4
    t = int(vmem_budget // max(per_row, 1))
    t = min(t, max_tile)
    t = max(8, (t // 8) * 8)                        # multiple of 8 sublanes
    if S <= t:
        return S                                    # single full-seq tile
    return t


def language_modeling_loss(logits, labels, *, ignore_index=-100,
                           label_smoothing=0.0, max_tile_s=512):
    """Pallas equivalent of LanguageModelingLoss.forward.

    logits: (B, S, V) float (f32 or bf16); labels: (B, S) int.  Returns scalar
    f32 mean cross-entropy over non-ignored shifted tokens.  If every label is
    ignore_index the result is NaN (same as PyTorch).
    """
    B, S, V = logits.shape
    itemsize = jnp.dtype(logits.dtype).itemsize
    tile_budget, vmem_limit = _vmem_budgets()
    tile_s = _pick_tile_s(S, V, itemsize, max_tile=max_tile_s,
                          vmem_budget=tile_budget)

    num_s_tiles = -(-(S - 1) // tile_s)             # ceil((S-1)/tile_s)
    S_pad = num_s_tiles * tile_s

    # Only the tiny label tensor is shifted/padded in JAX; padded positions
    # (dropped last logit row + edge padding) carry ignore_index.
    shift_labels = labels[:, 1:].astype(jnp.int32)                  # (B, S-1)
    shift_labels = jnp.pad(shift_labels, ((0, 0), (0, S_pad - (S - 1))),
                           constant_values=ignore_index)
    shift_labels = shift_labels.reshape(B, S_pad, 1)

    kernel = functools.partial(_ce_partial_kernel, ignore_index=ignore_index,
                               label_smoothing=float(label_smoothing),
                               vocab_size=V)

    partials = pl.pallas_call(
        kernel,
        out_shape=jax.ShapeDtypeStruct((B, num_s_tiles, 2, 128), jnp.float32),
        grid_spec=pltpu.PrefetchScalarGridSpec(
            num_scalar_prefetch=0,
            grid=(B, num_s_tiles),
            in_specs=[
                # full, unshifted logits straight from HBM; vocab whole on lanes
                pl.BlockSpec((1, tile_s, V), lambda b, s: (b, s, 0)),
                pl.BlockSpec((1, tile_s, 1), lambda b, s: (b, s, 0)),
            ],
            # lane-dense per-tile partials; each grid point owns its block
            out_specs=pl.BlockSpec((1, 1, 2, 128), lambda b, s: (b, s, 0, 0)),
        ),
        compiler_params=pltpu.CompilerParams(
            dimension_semantics=("parallel", "parallel"),
            vmem_limit_bytes=vmem_limit),
    )(logits, shift_labels)

    loss_sum = jnp.sum(partials[:, :, 0, 0])
    valid_cnt = jnp.sum(partials[:, :, 1, 0])
    # mean over non-ignored tokens (PyTorch CrossEntropyLoss 'mean' reduction)
    return loss_sum / valid_cnt


def _reference_loss(logits, labels, ignore_index=-100, label_smoothing=0.0):
    """Pure-JAX reference mirroring torch.nn.CrossEntropyLoss semantics."""
    B, S, V = logits.shape
    x = logits[:, :-1, :].reshape(-1, V).astype(jnp.float32)
    y = labels[:, 1:].reshape(-1)
    lse = jax.nn.logsumexp(x, axis=-1)
    y_safe = jnp.where(y == ignore_index, 0, y)
    tgt = jnp.take_along_axis(x, y_safe[:, None], axis=-1)[:, 0]
    nll = lse - tgt
    smooth = lse - jnp.mean(x, axis=-1)
    per = (1.0 - label_smoothing) * nll + label_smoothing * smooth
    valid = (y != ignore_index).astype(jnp.float32)
    return jnp.sum(per * valid) / jnp.sum(valid)


if __name__ == "__main__":
    B, S, V = 2, 20, 128
    key = jax.random.PRNGKey(0)
    k1, k2, k3 = jax.random.split(key, 3)
    logits = jax.random.normal(k1, (B, S, V), dtype=jnp.float32)
    labels = jax.random.randint(k2, (B, S), 0, V, dtype=jnp.int32)
    # sprinkle some ignore_index (-100) tokens, like padding
    mask = jax.random.bernoulli(k3, 0.2, (B, S))
    labels = jnp.where(mask, jnp.int32(-100), labels)
    logits_bf16 = logits.astype(jnp.bfloat16)

    ok = True
    for eps in (0.0, 0.1):
        ref_f32 = _reference_loss(logits, labels, ignore_index=-100,
                                  label_smoothing=eps)
        ref_bf16 = _reference_loss(logits_bf16, labels, ignore_index=-100,
                                   label_smoothing=eps)
        cases = [
            # (name, logits, reference, max_tile_s, rtol, atol)
            ("f32/single-tile", logits, ref_f32, 512, 1e-4, 1e-4),
            ("f32/multi-tile", logits, ref_f32, 8, 1e-4, 1e-4),  # edge OOB rows
            ("bf16/single-tile", logits_bf16, ref_bf16, 512, 2e-2, 2e-2),
            ("bf16/multi-tile", logits_bf16, ref_bf16, 8, 2e-2, 2e-2),
        ]
        for name, lg, ref, mts, rtol, atol in cases:
            loss = language_modeling_loss(lg, labels, ignore_index=-100,
                                          label_smoothing=eps, max_tile_s=mts)
            loss = jax.block_until_ready(loss)
            if not jnp.allclose(loss, ref, rtol=rtol, atol=atol):
                ok = False
                print("mismatch", name, "eps=", eps, float(loss), float(ref))

    if ok:
        print("KERNEL_OK")
</pallas_src>

<mosaic_0001>
module attributes {stable_mosaic.version = 11 : i64} {
  func.func @_ce_partial_kernel(%arg0: i32, %arg1: i32, %arg2: memref<1x20x128xf32, #tpu.memory_space<vmem>>, %arg3: memref<1x20x1xi32, #tpu.memory_space<vmem>>, %arg4: memref<1x1x2x128xf32, #tpu.memory_space<vmem>>) attributes {dimension_semantics = [#tpu.dimension_semantics<parallel>, #tpu.dimension_semantics<parallel>], iteration_bounds = array<i64: 2, 1>, scalar_prefetch = 0 : i64, scratch_operands = 0 : i64, tpu.core_type = #tpu.core_type<tc>, window_params = [{transform_indices = @transform_0, window_bounds = array<i64: 1, 20, 128>}, {transform_indices = @transform_1, window_bounds = array<i64: 1, 20, 1>}, {transform_indices = @transform_2, window_bounds = array<i64: 1, 1, 2, 128>}]} {
    %c0 = arith.constant 0 : index
    %c0_0 = arith.constant 0 : index
    %c0_1 = arith.constant 0 : index
    %0 = vector.load %arg2[%c0, %c0_0, %c0_1] : memref<1x20x128xf32, #tpu.memory_space<vmem>>, vector<1x20x128xf32>
    %1 = vector.shape_cast %0 : vector<1x20x128xf32> to vector<20x128xf32>
    %c0_2 = arith.constant 0 : index
    %c0_3 = arith.constant 0 : index
    %c0_4 = arith.constant 0 : index
    %2 = vector.load %arg3[%c0_2, %c0_3, %c0_4] : memref<1x20x1xi32, #tpu.memory_space<vmem>>, vector<1x20x1xi32>
    %3 = vector.shape_cast %2 : vector<1x20x1xi32> to vector<20x1xi32>
    %cst = arith.constant dense<0xFF800000> : vector<20xf32>
    %4 = vector.multi_reduction <maximumf>, %1, %cst [1] : vector<20x128xf32> to vector<20xf32>
    %5 = vector.shape_cast %4 : vector<20xf32> to vector<20x1xf32>
    %6 = vector.broadcast %5 : vector<20x1xf32> to vector<20x128xf32>
    %7 = arith.subf %1, %6 : vector<20x128xf32>
    %8 = math.exp %7 : vector<20x128xf32>
    %cst_5 = arith.constant dense<0.000000e+00> : vector<20xf32>
    %9 = vector.multi_reduction <add>, %8, %cst_5 [1] : vector<20x128xf32> to vector<20xf32>
    %10 = vector.shape_cast %9 : vector<20xf32> to vector<20x1xf32>
    %11 = math.log %10 : vector<20x1xf32>
    %12 = arith.addf %5, %11 : vector<20x1xf32>
    %13 = tpu.iota {dimensions = array<i32: 1>} : vector<20x128xi32>
    %14 = vector.broadcast %3 : vector<20x1xi32> to vector<20x128xi32>
    %15 = arith.cmpi eq, %13, %14 : vector<20x128xi32>
    %cst_6 = arith.constant 0.000000e+00 : f32
    %16 = vector.broadcast %cst_6 : f32 to vector<20x128xf32>
    %17 = arith.select %15, %1, %16 : vector<20x128xi1>, vector<20x128xf32>
    %cst_7 = arith.constant dense<0.000000e+00> : vector<20xf32>
    %18 = vector.multi_reduction <add>, %17, %cst_7 [1] : vector<20x128xf32> to vector<20xf32>
    %19 = vector.shape_cast %18 : vector<20xf32> to vector<20x1xf32>
    %20 = arith.subf %12, %19 : vector<20x1xf32>
    %c-100_i32 = arith.constant -100 : i32
    %21 = vector.broadcast %c-100_i32 : i32 to vector<20x1xi32>
    %22 = arith.cmpi ne, %3, %21 : vector<20x1xi32>
    %cst_8 = arith.constant 0.000000e+00 : f32
    %23 = vector.broadcast %cst_8 : f32 to vector<20x1xf32>
    %24 = arith.select %22, %20, %23 : vector<20x1xi1>, vector<20x1xf32>
    %25 = vector.shape_cast %24 : vector<20x1xf32> to vector<1x20x1xf32>
    %cst_9 = arith.constant dense<0.000000e+00> : vector<1xf32>
    %26 = vector.multi_reduction <add>, %25, %cst_9 [1, 2] : vector<1x20x1xf32> to vector<1xf32>
    %27 = vector.shape_cast %26 : vector<1xf32> to vector<1x1x1xf32>
    %28 = vector.extract %27[0, 0, 0] : f32 from vector<1x1x1xf32>
    %29 = arith.extui %22 : vector<20x1xi1> to vector<20x1xi32>
    %30 = arith.sitofp %29 : vector<20x1xi32> to vector<20x1xf32>
    %31 = vector.shape_cast %30 : vector<20x1xf32> to vector<1x20x1xf32>
    %cst_10 = arith.constant dense<0.000000e+00> : vector<1xf32>
    %32 = vector.multi_reduction <add>, %31, %cst_10 [1, 2] : vector<1x20x1xf32> to vector<1xf32>
    %33 = vector.shape_cast %32 : vector<1xf32> to vector<1x1x1xf32>
    %34 = vector.extract %33[0, 0, 0] : f32 from vector<1x1x1xf32>
    %35 = vector.broadcast %28 : f32 to vector<1x1x1x128xf32>
    %36 = vector.broadcast %34 : f32 to vector<1x1x1x128xf32>
    %37 = tpu.concatenate %35, %36 in 2 : vector<1x1x1x128xf32>, vector<1x1x1x128xf32> -> vector<1x1x2x128xf32>
    %c0_11 = arith.constant 0 : index
    %c0_12 = arith.constant 0 : index
    %c0_13 = arith.constant 0 : index
    %c0_14 = arith.constant 0 : index
    %38 = vector.load %arg4[%c0_11, %c0_12, %c0_13, %c0_14] : memref<1x1x2x128xf32, #tpu.memory_space<vmem>>, vector<1x1x2x128xf32>
    tpu.vector_store %arg4[%c0_11, %c0_12, %c0_13, %c0_14], %37 {strides = array<i32>} : memref<1x1x2x128xf32, #tpu.memory_space<vmem>>, vector<1x1x2x128xf32>,
    return
  }
  func.func @transform_0(%arg0: i32, %arg1: i32) -> (i32, i32, i32) {
    %c0_i32 = arith.constant 0 : i32
    %c0_i32_0 = arith.constant 0 : i32
    return %arg0, %arg1, %c0_i32 : i32, i32, i32
  }
  func.func @transform_1(%arg0: i32, %arg1: i32) -> (i32, i32, i32) {
    %c0_i32 = arith.constant 0 : i32
    %c0_i32_0 = arith.constant 0 : i32
    return %arg0, %arg1, %c0_i32 : i32, i32, i32
  }
  func.func @transform_2(%arg0: i32, %arg1: i32) -> (i32, i32, i32, i32) {
    %c0_i32 = arith.constant 0 : i32
    %c0_i32_0 = arith.constant 0 : i32
    %c0_i32_1 = arith.constant 0 : i32
    return %arg0, %arg1, %c0_i32, %c0_i32_0 : i32, i32, i32, i32
  }
}

</mosaic_0001>

<bundles_post_ra>
// kernel: tpu_custom_call.1
= control target key start
LH: loop header
LB: loop body
LE: loop exit
PB: predicated region body
PF: predicated region fallthrough
CT: control target
= control target key end

     0   :  { %7 = vsyncpa [#allocation3], 0  ;;  %s765_s0 = inlined_call_operand.vmem [shape: f32[2,20,128], index: 0, kind: input, shape index: {}]   ;;  %s766_s1 = inlined_call_operand.vmem [shape: s32[2,20,1], index: 1, kind: input, shape index: {}]   ;;  %s767_s2 = inlined_call_operand.hbm [shape: f32[2,1,2,128], index: 2, kind: output, shape index: {}]  }
   0x1   :  { %9 = vsyncpa [#allocation3 + $0x1], 0  ;;  %s617_s9 = smov 0   ;;  %s619_s10 = smov 0  }
   0x2   :  { %s621_s11 = smov 0   ;;  %s623_s12 = smov 0  }
   0x3   :  { %s625_s13 = smov 0   ;;  %s627_s14 = smov 0  }
   0x4 LB: > { %s428_s15 = sadd.s32 4294967295, %s597_s14   ;;  %s429_s16 = sadd.s32 4294967294, %s597_s14   ;;  %s597_s14 = sphi %s627_s14, %s15_s14   ;;  %s593_s13 = sphi %s625_s13, %s774_s13   ;;  %s589_s12 = sphi %s623_s12, %s773_s12   ;;  %s585_s11 = sphi %s621_s11, %s772_s11   ;;  %s581_s10 = sphi %s619_s10, %s771_s10   ;;  %s577_s9 = sphi %s617_s9, %s770_s9  }
   0x5   : > { %s27_s17 = sadd.s32 1, %s593_s13  ;;  %s92_s18 = sadd.s32 1, %s585_s11 }
   0x6   : > { %p29_p0 = scmp.ge.s32.totalorder %s27_s17, 2  ;;  %p102_p1 = scmp.ne.s32.totalorder %s585_s11, %s581_s10 }
   0x7   : > { %p103_p2 = scmp.eq.s32.totalorder %s428_s15, 1  ;;  %p108_p3 = scmp.ne.s32.totalorder %s581_s10, %s577_s9 }
   0x8   : > { %s776_s17 = smov (%p29_p0, %s27_s17), 0  ;;  %p109_p5 = scmp.eq.s32.totalorder %s429_s16, 1 }
   0x9   : > { %p657_p4 = por %p103_p2, %p102_p1  ;;  %s87_s20 = ssub.s32 %s593_s13, %s776_s17 }
   0xa   : > { %p432_p6 = scmp.ge.s32.totalorder %s597_s14, 1  ;;  %p90_p7 = scmp.eq.s32.totalorder %s87_s20, 0 }
   0xb   : > { %p664_p8 = por %p109_p5, %p108_p3  ;;  %p153_p9 = scmp.lt.s32.totalorder %s597_s14, 3 }
   0xc   : > { %s670_s22 = scalar_select %p90_p7, %s585_s11, %s92_s18  }
   0xd   : > { %p154_p10 = pnand %p432_p6, %p153_p9 }
   0xe   : > { %p189_p11 = scmp.lt.s32.totalorder (!%p154_p10), %s589_s12, 1  ;;  %v599_v0 = vmov (!%p154_p10), 0   ;;  %vm218_vm0 = vcmask (!%p154_p10), 1043456   ;;  %v247_v17 = vlaneseq (!%p154_p10)  ;;  %v600_v30 = vmov (!%p154_p10), 0.0   ;;  %s185_s3 = sand.u32 (!%p154_p10), 1, %s581_s10  }
   0xf   : > { %157 = sbr.rel (%p154_p10) target bundleno = 579 (0x243), region = 28  ;;  %505 = vset.pattern.permute.xlu1 (!%p154_p10), %v599_v0  ;;  %506 = vset.pattern.permute.xlu0 (!%p154_p10), %v599_v0  ;;  %vm280_vm6 = vcmask (!%p154_p10), 7168   ;;  %vm284_vm8 = vcmask (!%p154_p10), 3072   ;;  %s433_s4 = sshll.u32 (!%p154_p10), %s185_s3, 1  ;;  %vm318_vm9 = vcmask (!%p154_p10), 1040384  }
  0x10   : > { %v248_v18 = vand.u32 (!%p154_p10), 127, %v247_v17  ;;  %s440_s5 = sshll.u32 (!%p154_p10), %s589_s12, 5  ;;  %s187_s7 = scalar_lea.vmem (!%p154_p10), [#allocation2], %s433_s4 }
  0x11   : > { %s336_s8 = sshll.u32 (!%p154_p10), %s187_s7, 4  ;;  %s718_s20 = scalar_lea.hbm (!%p154_p10), %s767_s2, %s440_s5  ;;  %s720_s8 = int_to_ptr.vmem [resolvable:$true] %s336_s8 }
  0x16   : > { %s190_s23 = scalar_select %p189_p11, %s589_s12, 1 }
  0x17   : > { %s322_s12 = scalar_lea.sflag [#allocation3], %s185_s3 }
  0x18   : > { %s443_s24 = smul.u32 24, %s190_s23  ;;  %s519_s23 = scalar_lea.vmem %s720_s8, 32 }
  0x19   : > { %p520_p12 = scmp.ne.s32.totalorder %s720_s8, %s519_s23 }
  0x1a   : > { %s196_s27 = scalar_lea.vmem %s765_s0, %s443_s24  ;;  %s206_s30 = scalar_lea.vmem %s766_s1, %s443_s24 }
  0x1b   : > { %v208_v1 = vld [vmem:[%s196_s27] sm:$0xff]  ;;  %v210_v2 = vld [vmem:[%s196_s27 + $0x10] sm:$0xf]  ;;  %v209_v4 = vld [vmem:[%s196_s27 + $0x8] sm:$0xff]  ;;  %p521_p13 = pnand %p520_p12, %p657_p4  ;;  %s601_s24 = smov [#allocation2]  }
  0x1c   : > { %214 = vmax.xlane.f32.xlu0 %v208_v1  ;;  %v219_v3 = vsel %vm218_vm0, %v210_v2, -inf  ;;  %v681_v5 = vld [vmem:[%s206_s30] sm:$0xff]  ;;  %v684_v6 = vld [vmem:[%s206_s30 + $0x10] sm:$0xf]  ;;  %v687_v7 = vld [vmem:[%s206_s30 + $0x8] sm:$0xff]  ;;  %s523_s25 = sshll.u32 %s601_s24, 4  ;;  %s524_s25 = int_to_ptr.vmem [resolvable:$false] %s523_s25 }
  0x1d   : > { %220 = vmax.xlane.f32.xlu1 %v219_v3  ;;  %vm274_vm4 = vcmp.ne.s32.totalorder %v681_v5, 4294967196  ;;  %vm275_vm5 = vcmp.ne.s32.totalorder %v687_v7, 4294967196  ;;  %vm276_vm7 = vcmp.ne.s32.totalorder %v684_v6, 4294967196  ;;  %p522_p0 = pneg %p521_p13  ;;  %s525_s26 = scalar_lea.vmem %s524_s25, 64 }
  0x1e   : > { %v436_v31 = vsel %vm274_vm4, 1.0, %v600_v30  ;;  %v437_v32 = vsel %vm275_vm5, 1.0, %v600_v30  ;;  %v438_v35 = vsel %vm276_vm7, 1.0, %v600_v30  ;;  %p526_p1 = scmp.lt.s32.totalorder %s720_s8, %s524_s25  ;;  %p527_p2 = scmp.lt.s32.totalorder %s525_s26, %s519_s23 }
  0x1f   : > { %v302_v33 = vsel %vm280_vm6, %v436_v31, 0.0  ;;  %v303_v34 = vsel %vm280_vm6, %v437_v32, 0.0  ;;  %v305_v37 = vsel %vm284_vm8, %v438_v35, 0.0 }
  0x20   : > { %216 = vmax.xlane.f32.xlu0 %v209_v4  ;;  %v304_v36 = vadd.f32 %v303_v34, %v302_v33  ;;  %p528_p3 = por %p527_p2, %p526_p1 }
  0x22   : > { %v306_v38 = vadd.f32 %v305_v37, %v304_v36  ;;  %p529_p5 = pnand %p528_p3, %p522_p0 }
  0x2e   : > { %250 = vperm.xlu1 %505, %v681_v5  }
  0x32   : > { %256 = vperm.xlu1 %505, %v684_v6  }
  0x36   : > { %253 = vperm.xlu0 %506, %v687_v7  }
  0xa9   : > { %v215_v8 = vpop.xlane.xlu0 %214 }
  0xaa   : > { %v222_v9 = vsub.f32 %v208_v1, %v215_v8  ;;  %v221_v10 = vpop.xlane.xlu1 %220 }
  0xab   : > { %v224_v11 = vsub.f32 %v210_v2, %v221_v10 }
  0xac   : > { %v225_v12 = vmul.f32 1.442695, %v222_v9 }
  0xad   : > { %v229_v13 = vmul.f32 1.442695, %v224_v11  ;;  %v217_v14 = vpop.xlane.xlu0 %216 }
  0xae   : > { %507 = vpow2.f32 %v225_v12  ;;  %v223_v15 = vsub.f32 %v209_v4, %v217_v14  ;;  %v251_v20 = vpop.permute.xlu1 %250 }
  0xaf   : > { %509 = vpow2.f32 %v229_v13  ;;  %vm258_vm1 = vcmp.eq.s32.totalorder %v248_v18, %v251_v20 }
  0xb0   : > { %v227_v16 = vmul.f32 1.442695, %v223_v15  ;;  %v261_v25 = vsel %vm258_vm1, %v208_v1, 0.0 }
  0xb2   : > { %511 = vpow2.f32 %v227_v16  ;;  %v257_v26 = vpop.permute.xlu1 %256 }
  0xb3   : > { %vm260_vm3 = vcmp.eq.s32.totalorder %v248_v18, %v257_v26 }
  0xb4   : > { %v263_v28 = vsel %vm260_vm3, %v210_v2, 0.0 }
  0xb5   : > { %v254_v24 = vpop.permute.xlu0 %253  ;;  %v268_v29 = vsel %vm218_vm0, %v263_v28, 0.0 }
  0xb6   : > { %vm259_vm2 = vcmp.eq.s32.totalorder %v248_v18, %v254_v24 }
  0xb7   : > { %v262_v27 = vsel %vm259_vm2, %v209_v4, 0.0 }
  0xb8   : > { %v508_v19 = vpop.eup %507 }
  0xb9   : > { %v510_v21 = vpop.eup %509  ;;  %231 = vadd.xlane.f32.xlu1 %v508_v19 }
  0xba   : > { %v235_v22 = vsel %vm218_vm0, %v510_v21, 0.0 }
  0xbc   : > { %v512_v23 = vpop.eup %511 }
  0xbd   : > { %236 = vadd.xlane.f32.xlu1 %v235_v22  ;;  %233 = vadd.xlane.f32.xlu0 %v512_v23 }
  0xc1   : > { %264 = vadd.xlane.f32.xlu1 %v261_v25 }
  0xc5   : > { %266 = vadd.xlane.f32.xlu1 %v262_v27 }
  0xc9   : > { %269 = vadd.xlane.f32.xlu1 %v268_v29 }
 0x146   : > { %v232_v39 = vpop.xlane.xlu1 %231 }
 0x147   : > { %513 = vlog2.f32 %v232_v39 }
 0x14a   : > { %v237_v40 = vpop.xlane.xlu1 %236  ;;  %v234_v41 = vpop.xlane.xlu0 %233 }
 0x14b   : > { %515 = vlog2.f32 %v237_v40 }
 0x14c   : > { %517 = vlog2.f32 %v234_v41 }
 0x14e   : > { %v265_v42 = vpop.xlane.xlu1 %264 }
 0x151   : > { %v514_v43 = vpop.eup %513 }
 0x152   : > { %v239_v44 = vmul.f32 0.6931472, %v514_v43  ;;  %v267_v45 = vpop.xlane.xlu1 %266 }
 0x154   : > { %v244_v46 = vadd.f32 %v239_v44, %v215_v8 }
 0x155   : > { %v516_v47 = vpop.eup %515 }
 0x156   : > { %v518_v48 = vpop.eup %517  ;;  %v243_v49 = vmul.f32 0.6931472, %v516_v47  ;;  %v271_v51 = vsub.f32 %v244_v46, %v265_v42  ;;  %v270_v54 = vpop.xlane.xlu1 %269 }
 0x157   : > { %v241_v50 = vmul.f32 0.6931472, %v518_v48 }
 0x158   : > { %v246_v52 = vadd.f32 %v243_v49, %v221_v10  ;;  %v277_v56 = vsel %vm274_vm4, %v271_v51, 0.0 }
 0x159   : > { %v245_v53 = vadd.f32 %v241_v50, %v217_v14  ;;  %v281_v60 = vsel %vm280_vm6, %v277_v56, 0.0 }
 0x15a   : > { %v273_v55 = vsub.f32 %v246_v52, %v270_v54 }
 0x15b   : > { %v272_v57 = vsub.f32 %v245_v53, %v267_v45 }
 0x15c   : > { %v279_v59 = vsel %vm276_vm7, %v273_v55, 0.0 }
 0x15d   : > { %v278_v58 = vsel %vm275_vm5, %v272_v57, 0.0  ;;  %v285_v63 = vsel %vm284_vm8, %v279_v59, 0.0 }
 0x15e   : > { %v282_v61 = vsel %vm280_vm6, %v278_v58, 0.0 }
 0x15f   : > { %v283_v62 = vadd.f32 %v282_v61, %v281_v60 }
 0x161   : > { %v286_v0 = vadd.f32 %v285_v63, %v283_v62 }
 0x163   : > { %287 = vadd.xlane.f32.xlu1 %v286_v0 }
 0x167   : > { %307 = vadd.xlane.f32.xlu1 %v306_v38 }
 0x1f0   : > { %v288_v1 = vpop.xlane.xlu1 %287 }
 0x1f1   : > { %v289_v2 = vrot.slane %v288_v1, 4 }
 0x1f3   : > { %v290_v3 = vadd.f32 %v289_v2, %v288_v1 }
 0x1f4   : > { %v308_v4 = vpop.xlane.xlu1 %307 }
 0x1f5   : > { %v291_v5 = vrot.slane %v290_v3, 2  ;;  %v309_v7 = vrot.slane %v308_v4, 4 }
 0x1f7   : > { %v310_v6 = vadd.f32 %v309_v7, %v308_v4  ;;  %v292_v8 = vadd.f32 %v291_v5, %v290_v3 }
 0x1f9   : > { %v311_v9 = vrot.slane %v310_v6, 2  ;;  %v293_v10 = vrot.slane %v292_v8, 1 }
 0x1fb   : > { %v312_v11 = vadd.f32 %v311_v9, %v310_v6  ;;  %v294_v12 = vadd.f32 %v293_v10, %v292_v8 }
 0x1fd   : > { %444 = vpush %v294_v12  ;;  %v313_v13 = vrot.slane %v312_v11, 1 }
 0x1ff   : > { %v314_v14 = vadd.f32 %v313_v13, %v312_v11 }
 0x201   : > { %446 = vpush %v314_v14 }
 0x22e   : > { %s445_s6 = spop %444 }
 0x22f   : > { %v316_v15 = vstv %s445_s6 }
 0x232   : > { %s447_s15 = spop %446 }
 0x233   : > { %v317_v16 = vstv %s447_s15 }
 0x234   : > { %v319_v17 = vsel %vm318_vm9, %v316_v15, %v317_v16 }
 0x235   : > { %320 = vst [vmem:[%s187_s7] sm:$0x3] %v319_v17 }
 0x236   : > { %532 = shalt.err (!%p529_p5)
}
 0x237   : > { %s533_s27 = scalar_lea.hbm %s718_s20, 32  ;;  %s537_s30 = scalar_lea.hbm %s767_s2, 64 }
 0x238   : > { %p534_p6 = scmp.ne.s32.totalorder %s718_s20, %s533_s27  ;;  %p538_p10 = scmp.lt.u32.totalorder %s718_s20, %s767_s2 }
 0x239   : > { %p539_p11 = scmp.lt.u32.totalorder %s537_s30, %s533_s27  ;;  %p541_p13 = scmp.lt.u32.totalorder %s533_s27, %s718_s20 }
 0x23a   : > { %p535_p7 = pnand %p534_p6, %p657_p4 }
 0x23b   : > { %p540_p12 = por %p539_p11, %p538_p10 }
 0x23c   : > { %p536_p9 = pneg %p535_p7 }
 0x23d   : > { %p542_p0 = por %p541_p13, %p540_p12 }
 0x23f   : > { %p543_p1 = pnand %p542_p0, %p536_p9 }
 0x241   : > { %546 = shalt.err (!%p543_p1)
}
 0x242   : > { %448 = dma.vmem_to_hbm [thread:$0]  (%p657_p4), %s720_s8, 32, %s718_s20, %s322_s12  }
 0x243 PF: > { %p454_p2 = scmp.ge.s32.totalorder %s597_s14, 2  ;;  %s348_s5 = sand.u32 1, %s577_s9  }
 0x244   : > { %s349_s6 = scalar_lea.sflag [#allocation3], %s348_s5 }
 0x245   : > { %p451_p3 = pnand %p454_p2, %p664_p8 }
 0x247   : > { %572 = dma.done.wait (!%p451_p3), %s349_s6, 32  }
 0x248   : > { %574 = vsyncadd (!%p451_p3), %s349_s6, 4294967264  ;;  %s15_s14 = sadd.s32 1, %s597_s14   ;;  %s770_s9 = smov %s581_s10 }
 0x249   : > { %p12_p5 = scmp.ge.s32.totalorder %s15_s14, 4   ;;  %s771_s10 = smov %s585_s11 }
 0x24a   : > { %s772_s11 = smov %s670_s22  ;;  %s773_s12 = smov %s593_s13 }
 0x24b   : > { %s774_s13 = smov %s776_s17  ;;  %14 = sbr.rel (!%p12_p5) target bundleno = 4 (0x4), region = 66 }
 0x252   :  { %354 = vsyncpa [#allocation3], 1 }
 0x253   :  { %356 = vsyncpa [#allocation3 + $0x1], 1 }

</bundles_post_ra>
